<compile_context>
chip_gen: v7x
topology: tpu7x:2x2x1
jax: 0.10.0
libtpu: 0.0.40
codegen_flags: <defaults>
</compile_context>

<pallas_src>
import jax
import jax.numpy as jnp
from jax.experimental import pallas as pl
from jax.experimental.pallas import tpu as pltpu


def _round_up(x: int, m: int) -> int:
    return ((x + m - 1) // m) * m


def _srip_kernel(mod_ref, first_ref, last_ref, w_ref, u_ref, out_ref, g_ref):
    """One grid step == one TM-row chunk of one module's reshaped weight.

    mod_ref/first_ref/last_ref : (T,) int32 SMEM  per-chunk module id / flags
    w_ref  : (TM, N_pad)    bf16  current row chunk of the packed weight slab
    u_ref  : (1, 1, N_pad)  f32   lane-major probe of this chunk's module
    out_ref: (1, 128)       f32   resident loss accumulator (all lanes = loss)
    g_ref  : (N_pad, N_pad) f32   resident Gram accumulator (reset per module)
    """
    t = pl.program_id(0)

    @pl.when(t == 0)
    def _init_loss():
        out_ref[...] = jnp.zeros_like(out_ref)

    @pl.when(first_ref[t] != 0)
    def _init_gram():
        g_ref[...] = jnp.zeros_like(g_ref)

    # Partial Gram of this chunk: G += W_chunk^T @ W_chunk  (MXU, f32 acc).
    # Zero-padded rows contribute nothing, so per-module row padding is exact.
    w = w_ref[...]
    g_ref[...] += jax.lax.dot_general(
        w, w, (((0,), (0,)), ((), ())), preferred_element_type=jnp.float32)

    @pl.when(last_ref[t] != 0)
    def _finalize_module():
        g = g_ref[...]                    # (N_pad, N_pad) f32
        u = u_ref[0]                      # (1, N_pad)     f32, zero padded lanes

        def apply_g_minus_i(x):
            # x @ (G - I); padded rows/cols of G and padded lanes of x are zero,
            # so padded lanes of the result stay exactly zero (padding is exact).
            return jnp.dot(x, g, preferred_element_type=jnp.float32) - x

        v = apply_g_minus_i(u)
        # F.normalize(v, p=2, dim=0), eps=1e-12:
        #   v / max(||v||, 1e-12) == v * rsqrt(max(||v||^2, 1e-24))   (EUP rsqrt)
        v = v * jax.lax.rsqrt(jnp.maximum(jnp.sum(v * v), jnp.float32(1e-24)))
        v = apply_g_minus_i(v)
        # torch.linalg.norm(col, ord=2)**2 == sum(col**2) for a single column.
        out_ref[...] = out_ref[...] + jnp.sum(v * v)


def _reshape_weight(kind: str, w: jax.Array) -> jax.Array:
    """Mirror the PyTorch SRIP reshape logic (trace time, fused by XLA into the
    single packing copy that builds the slab)."""
    if kind == "conv2d":
        rows = w.shape[0]
        cols = w.size // rows
        w2d = w.reshape(rows, cols)
        return w2d if rows > cols else w2d.T
    elif kind == "linear":
        return w.T
    raise ValueError(kind)


def srip_loss(modules, probe_key: jax.Array, *, max_chunk_rows: int = 256) -> jax.Array:
    """modules: list of (kind, weight).  BatchNorm / weightless modules are
    simply not included (the PyTorch loop skips them)."""
    mats, probes = [], []
    for idx, (kind, w) in enumerate(modules):
        m2d = _reshape_weight(kind, w)
        n = m2d.shape[1]
        # torch.rand -> uniform [0, 1); deterministic per-module key.
        u = jax.random.uniform(
            jax.random.fold_in(probe_key, idx), (n,), dtype=jnp.float32)
        mats.append(m2d)
        probes.append(u)

    n_pad = _round_up(max(m.shape[1] for m in mats), 128)          # lane width
    # Row-chunk height: bounds per-step W block (and v7x VMEM) independent of
    # the largest layer; multiple of 16 for bf16 sublane packing.
    tm = min(max_chunk_rows, _round_up(max(m.shape[0] for m in mats), 16))

    chunk_counts = [-(-m.shape[0] // tm) for m in mats]             # ceil div
    total_chunks = sum(chunk_counts)

    # Packed weight slab: each module padded only to (cnt_i*tm, n_pad),
    # row-concatenated.  bf16 halves HBM traffic; Gram accumulation is f32.
    w_packed = jnp.concatenate([
        jnp.pad(m.astype(jnp.bfloat16),
                ((0, cnt * tm - m.shape[0]), (0, n_pad - m.shape[1])))
        for m, cnt in zip(mats, chunk_counts)], axis=0)             # (T*tm, n_pad)

    u_stack = jnp.stack([
        jnp.pad(u, (0, n_pad - u.shape[0]))[None, :]
        for u in probes])                                           # (L, 1, n_pad)

    # Per-chunk schedule tables (scalar-prefetched into SMEM).
    mod_of_chunk, first_flag, last_flag = [], [], []
    for mod_idx, cnt in enumerate(chunk_counts):
        for c in range(cnt):
            mod_of_chunk.append(mod_idx)
            first_flag.append(1 if c == 0 else 0)
            last_flag.append(1 if c == cnt - 1 else 0)
    mod_of_chunk = jnp.asarray(mod_of_chunk, jnp.int32)
    first_flag = jnp.asarray(first_flag, jnp.int32)
    last_flag = jnp.asarray(last_flag, jnp.int32)

    out = pl.pallas_call(
        _srip_kernel,
        out_shape=jax.ShapeDtypeStruct((1, 128), jnp.float32),
        grid_spec=pltpu.PrefetchScalarGridSpec(
            num_scalar_prefetch=3,
            grid=(total_chunks,),
            in_specs=[
                # Chunks are packed contiguously: chunk t lives at row block t.
                pl.BlockSpec((tm, n_pad), lambda t, mod, first, last: (t, 0)),
                # Probe of whichever module chunk t belongs to.
                pl.BlockSpec((1, 1, n_pad),
                             lambda t, mod, first, last: (mod[t], 0, 0)),
            ],
            out_specs=pl.BlockSpec((1, 128), lambda t, mod, first, last: (0, 0)),
            scratch_shapes=[pltpu.VMEM((n_pad, n_pad), jnp.float32)],
        ),
        compiler_params=pltpu.CompilerParams(
            # Gram scratch and the loss output are carried across grid steps.
            dimension_semantics=("arbitrary",),
        ),
    )(mod_of_chunk, first_flag, last_flag, w_packed, u_stack)
    return out[0, 0]


def _reference_srip_loss(modules, probe_key: jax.Array) -> jax.Array:
    """Pure-JAX f32 reference (explicit Gram + eye), same probe vectors."""
    loss = jnp.float32(0.0)
    for idx, (kind, w) in enumerate(modules):
        w2d = _reshape_weight(kind, w).astype(jnp.float32)
        n = w2d.shape[1]
        u = jax.random.uniform(
            jax.random.fold_in(probe_key, idx), (n,), dtype=jnp.float32)[:, None]
        g = w2d.T @ w2d
        w_tmp = g - jnp.eye(n, dtype=jnp.float32)
        v = w_tmp @ u
        v = v / jnp.maximum(jnp.sqrt(jnp.sum(v * v)), 1e-12)
        v = w_tmp @ v
        loss = loss + jnp.sum(v * v)
    return loss


if __name__ == "__main__":
    key = jax.random.PRNGKey(0)
    k_conv1, k_conv2, k_lin, k_probe = jax.random.split(key, 4)

    # Synthetic "model" weights, mirroring what the PyTorch SRIP forward would
    # iterate over.  BatchNorm2d is skipped by the original code, so not included.
    modules = [
        # Conv2d(in=4, out=8, k=3): rows=8 <= cols=36 -> transposed branch
        ("conv2d", 0.1 * jax.random.normal(k_conv1, (8, 4, 3, 3), jnp.float32)),
        # Conv2d(in=2, out=16, k=1): rows=16 > cols=2 -> non-transposed branch
        ("conv2d", 0.1 * jax.random.normal(k_conv2, (16, 2, 1, 1), jnp.float32)),
        # Linear(in=16, out=32): weight stored (out, in) like torch
        ("linear", 0.1 * jax.random.normal(k_lin, (32, 16), jnp.float32)),
    ]

    loss = jax.block_until_ready(srip_loss(modules, k_probe))
    ref = jax.block_until_ready(_reference_srip_loss(modules, k_probe))

    # bf16 weights (f32 Gram accumulation) => relaxed tolerance vs. f32 reference.
    assert jnp.allclose(loss, ref, rtol=3e-2, atol=1e-3), (loss, ref)

    print("KERNEL_OK")
</pallas_src>

<mosaic_0001>
module attributes {stable_mosaic.version = 11 : i64} {
  func.func @_srip_kernel(%arg0: i32, %arg1: memref<3xi32, #tpu.memory_space<smem>>, %arg2: memref<3xi32, #tpu.memory_space<smem>>, %arg3: memref<3xi32, #tpu.memory_space<smem>>, %arg4: memref<48x128xbf16, #tpu.memory_space<vmem>>, %arg5: memref<1x1x128xf32, #tpu.memory_space<vmem>>, %arg6: memref<1x128xf32, #tpu.memory_space<vmem>>, %arg7: memref<128x128xf32, #tpu.memory_space<vmem>>) attributes {dimension_semantics = [#tpu.dimension_semantics<arbitrary>], iteration_bounds = array<i64: 3>, scalar_prefetch = 3 : i64, scratch_operands = 1 : i64, tpu.core_type = #tpu.core_type<tc>, window_params = [{transform_indices = @transform_0, window_bounds = array<i64: 48, 128>}, {transform_indices = @transform_1, window_bounds = array<i64: 1, 1, 128>}, {pipeline_mode = #tpu.pipeline_mode<synchronous>, transform_indices = @transform_2, window_bounds = array<i64: 1, 128>}]} {
    %c0_i32 = arith.constant 0 : i32
    %0 = arith.cmpi eq, %arg0, %c0_i32 : i32
    %1 = arith.extui %0 : i1 to i32
    %c0_i32_0 = arith.constant 0 : i32
    %2 = arith.cmpi ne, %1, %c0_i32_0 : i32
    scf.if %2 {
      %cst_10 = arith.constant 0.000000e+00 : f32
      %18 = vector.broadcast %cst_10 : f32 to vector<1x128xf32>
      %c0_11 = arith.constant 0 : index
      %c0_12 = arith.constant 0 : index
      %19 = vector.load %arg6[%c0_11, %c0_12] : memref<1x128xf32, #tpu.memory_space<vmem>>, vector<1x128xf32>
      tpu.vector_store %arg6[%c0_11, %c0_12], %18 {strides = array<i32>} : memref<1x128xf32, #tpu.memory_space<vmem>>, vector<1x128xf32>,
    } else {
    }
    %3 = arith.index_cast %arg0 : i32 to index
    %4 = memref.load %arg2[%3] : memref<3xi32, #tpu.memory_space<smem>>
    %c0_i32_1 = arith.constant 0 : i32
    %5 = arith.cmpi ne, %4, %c0_i32_1 : i32
    %6 = arith.extui %5 : i1 to i32
    %c0_i32_2 = arith.constant 0 : i32
    %7 = arith.cmpi ne, %6, %c0_i32_2 : i32
    scf.if %7 {
      %cst_10 = arith.constant 0.000000e+00 : f32
      %18 = vector.broadcast %cst_10 : f32 to vector<128x128xf32>
      %c0_11 = arith.constant 0 : index
      %c0_12 = arith.constant 0 : index
      %19 = vector.load %arg7[%c0_11, %c0_12] : memref<128x128xf32, #tpu.memory_space<vmem>>, vector<128x128xf32>
      tpu.vector_store %arg7[%c0_11, %c0_12], %18 {strides = array<i32>} : memref<128x128xf32, #tpu.memory_space<vmem>>, vector<128x128xf32>,
    } else {
    }
    %c0 = arith.constant 0 : index
    %c0_3 = arith.constant 0 : index
    %8 = vector.load %arg4[%c0, %c0_3] : memref<48x128xbf16, #tpu.memory_space<vmem>>, vector<48x128xbf16>
    %c0_4 = arith.constant 0 : index
    %c0_5 = arith.constant 0 : index
    %9 = vector.load %arg7[%c0_4, %c0_5] : memref<128x128xf32, #tpu.memory_space<vmem>>, vector<128x128xf32>
    %cst = arith.constant dense<0.000000e+00> : vector<128x128xf32>
    %10 = tpu.matmul %8, %8, %cst {dimension_numbers = #tpu.dot_dimension_numbers<[0], [0], [1], [1], [0, 1, 1, 1], [], []>} : vector<48x128xbf16>, vector<48x128xbf16>, vector<128x128xf32> -> vector<128x128xf32>
    %11 = arith.addf %9, %10 : vector<128x128xf32>
    %c0_6 = arith.constant 0 : index
    %c0_7 = arith.constant 0 : index
    %12 = vector.load %arg7[%c0_6, %c0_7] : memref<128x128xf32, #tpu.memory_space<vmem>>, vector<128x128xf32>
    tpu.vector_store %arg7[%c0_6, %c0_7], %11 {strides = array<i32>} : memref<128x128xf32, #tpu.memory_space<vmem>>, vector<128x128xf32>,
    %13 = arith.index_cast %arg0 : i32 to index
    %14 = memref.load %arg3[%13] : memref<3xi32, #tpu.memory_space<smem>>
    %c0_i32_8 = arith.constant 0 : i32
    %15 = arith.cmpi ne, %14, %c0_i32_8 : i32
    %16 = arith.extui %15 : i1 to i32
    %c0_i32_9 = arith.constant 0 : i32
    %17 = arith.cmpi ne, %16, %c0_i32_9 : i32
    scf.if %17 {
      %c0_10 = arith.constant 0 : index
      %c0_11 = arith.constant 0 : index
      %18 = vector.load %arg7[%c0_10, %c0_11] : memref<128x128xf32, #tpu.memory_space<vmem>>, vector<128x128xf32>
      %c0_12 = arith.constant 0 : index
      %c0_13 = arith.constant 0 : index
      %c0_14 = arith.constant 0 : index
      %19 = vector.load %arg5[%c0_12, %c0_13, %c0_14] : memref<1x1x128xf32, #tpu.memory_space<vmem>>, vector<1x1x128xf32>
      %20 = vector.shape_cast %19 : vector<1x1x128xf32> to vector<1x128xf32>
      %cst_15 = arith.constant dense<0.000000e+00> : vector<1x128xf32>
      %21 = tpu.matmul %20, %18, %cst_15 {dimension_numbers = #tpu.dot_dimension_numbers<[1], [0], [0], [1], [0, 0, 1, 1], [], []>} : vector<1x128xf32>, vector<128x128xf32>, vector<1x128xf32> -> vector<1x128xf32>
      %22 = arith.subf %21, %20 : vector<1x128xf32>
      %23 = arith.mulf %22, %22 : vector<1x128xf32>
      %24 = vector.shape_cast %23 : vector<1x128xf32> to vector<1x1x128xf32>
      %cst_16 = arith.constant dense<0.000000e+00> : vector<1xf32>
      %25 = vector.multi_reduction <add>, %24, %cst_16 [1, 2] : vector<1x1x128xf32> to vector<1xf32>
      %26 = vector.shape_cast %25 : vector<1xf32> to vector<1x1x1xf32>
      %27 = vector.extract %26[0, 0, 0] : f32 from vector<1x1x1xf32>
      %cst_17 = arith.constant 1.000000e-24 : f32
      %28 = arith.maximumf %27, %cst_17 : f32
      %29 = math.rsqrt %28 : f32
      %30 = vector.broadcast %29 : f32 to vector<1x128xf32>
      %31 = arith.mulf %22, %30 : vector<1x128xf32>
      %cst_18 = arith.constant dense<0.000000e+00> : vector<1x128xf32>
      %32 = tpu.matmul %31, %18, %cst_18 {dimension_numbers = #tpu.dot_dimension_numbers<[1], [0], [0], [1], [0, 0, 1, 1], [], []>} : vector<1x128xf32>, vector<128x128xf32>, vector<1x128xf32> -> vector<1x128xf32>
      %33 = arith.subf %32, %31 : vector<1x128xf32>
      %c0_19 = arith.constant 0 : index
      %c0_20 = arith.constant 0 : index
      %34 = vector.load %arg6[%c0_19, %c0_20] : memref<1x128xf32, #tpu.memory_space<vmem>>, vector<1x128xf32>
      %35 = arith.mulf %33, %33 : vector<1x128xf32>
      %36 = vector.shape_cast %35 : vector<1x128xf32> to vector<1x1x128xf32>
      %cst_21 = arith.constant dense<0.000000e+00> : vector<1xf32>
      %37 = vector.multi_reduction <add>, %36, %cst_21 [1, 2] : vector<1x1x128xf32> to vector<1xf32>
      %38 = vector.shape_cast %37 : vector<1xf32> to vector<1x1x1xf32>
      %39 = vector.extract %38[0, 0, 0] : f32 from vector<1x1x1xf32>
      %40 = vector.broadcast %39 : f32 to vector<1x128xf32>
      %41 = arith.addf %34, %40 : vector<1x128xf32>
      %c0_22 = arith.constant 0 : index
      %c0_23 = arith.constant 0 : index
      %42 = vector.load %arg6[%c0_22, %c0_23] : memref<1x128xf32, #tpu.memory_space<vmem>>, vector<1x128xf32>
      tpu.vector_store %arg6[%c0_22, %c0_23], %41 {strides = array<i32>} : memref<1x128xf32, #tpu.memory_space<vmem>>, vector<1x128xf32>,
    } else {
    }
    return
  }
  func.func @transform_0(%arg0: i32, %arg1: memref<3xi32, #tpu.memory_space<smem>>, %arg2: memref<3xi32, #tpu.memory_space<smem>>, %arg3: memref<3xi32, #tpu.memory_space<smem>>) -> (i32, i32) {
    %c0_i32 = arith.constant 0 : i32
    %c0_i32_0 = arith.constant 0 : i32
    return %arg0, %c0_i32 : i32, i32
  }
  func.func @transform_1(%arg0: i32, %arg1: memref<3xi32, #tpu.memory_space<smem>>, %arg2: memref<3xi32, #tpu.memory_space<smem>>, %arg3: memref<3xi32, #tpu.memory_space<smem>>) -> (i32, i32, i32) {
    %0 = arith.index_cast %arg0 : i32 to index
    %1 = memref.load %arg1[%0] : memref<3xi32, #tpu.memory_space<smem>>
    %c0_i32 = arith.constant 0 : i32
    %c0_i32_0 = arith.constant 0 : i32
    %c0_i32_1 = arith.constant 0 : i32
    return %1, %c0_i32, %c0_i32_0 : i32, i32, i32
  }
  func.func @transform_2(%arg0: i32, %arg1: memref<3xi32, #tpu.memory_space<smem>>, %arg2: memref<3xi32, #tpu.memory_space<smem>>, %arg3: memref<3xi32, #tpu.memory_space<smem>>) -> (i32, i32) {
    %c0_i32 = arith.constant 0 : i32
    %c0_i32_0 = arith.constant 0 : i32
    %c0_i32_1 = arith.constant 0 : i32
    return %c0_i32, %c0_i32_0 : i32, i32
  }
}

</mosaic_0001>

<bundles_post_ra>
// kernel: tpu_custom_call.1
= control target key start
LH: loop header
LB: loop body
LE: loop exit
PB: predicated region body
PF: predicated region fallthrough
CT: control target
= control target key end

     0   :  { %s1325_s0 = inlined_call_operand.hbm [shape: s32[3], index: 0, kind: input, shape index: {}]   ;;  %s1326_s3 = inlined_call_operand.hbm [shape: bf16[144,128], index: 3, kind: input, shape index: {}]   ;;  %s1327_s4 = inlined_call_operand.vmem [shape: f32[3,1,128], index: 4, kind: input, shape index: {}]   ;;  %s1328_s5 = inlined_call_operand.hbm [shape: f32[1,128], index: 5, kind: output, shape index: {}]   ;;  %s1329_s1 = inlined_call_operand.vmem [shape: s32[3], index: 1, kind: input, shape index: {}]   ;;  %s1330_s2 = inlined_call_operand.vmem [shape: s32[3], index: 2, kind: input, shape index: {}]  }
   0x1   :  { %s973_s20 = scalar_lea.hbm %s1325_s0, 16 }
   0x2   :  { %p974_p0 = scmp.ne.s32.totalorder %s1325_s0, %s973_s20  ;;  %p977_p1 = scmp.lt.u32.totalorder %s973_s20, %s1325_s0 }
   0x4   :  { %p979_p2 = pnand %p977_p1, %p974_p0 }
   0x6   :  { %982 = shalt.err (!%p979_p2)  }
   0x7   :  { %s1105_s25 = smov [#allocation4]   ;;  %s12_s30 = sshll.u32 %s1329_s1, 4  ;;  %s13_s30 = int_to_ptr.vmem [resolvable:$true] %s12_s30 }
   0x8   :  { %11 = dma.hbm_to_smem %s1325_s0, 16, %s1105_s25, [#allocation3] }
   0x9   :  { %s16_s8 = sshll.u32 %s1330_s2, 4  ;;  %s983_s9 = scalar_lea.vmem %s13_s30, 16  ;;  %s17_s8 = int_to_ptr.vmem [resolvable:$true] %s16_s8 }
   0xa   :  { %p984_p3 = scmp.ne.s32.totalorder %s13_s30, %s983_s9  ;;  %p988_p4 = scmp.lt.s32.totalorder %s13_s30, %s13_s30 }
   0xb   :  { %p989_p5 = scmp.lt.s32.totalorder %s983_s9, %s983_s9 }
   0xd   :  { %p990_p6 = por %p989_p5, %p988_p4 }
   0xf   :  { %p991_p7 = pnand %p990_p6, %p984_p3 }
  0x11   :  { %994 = shalt.err (!%p991_p7)  }
  0x12   :  { %s1106_s10 = smov [#allocation5]   ;;  %s995_s0 = scalar_lea.vmem %s17_s8, 16 }
  0x13   :  { %15 = dma.vmem_to_smem %s13_s30, 16, %s1106_s10, [#allocation3] }
  0x14   :  { %p996_p8 = scmp.ne.s32.totalorder %s17_s8, %s995_s0  ;;  %p1000_p9 = scmp.lt.s32.totalorder %s17_s8, %s17_s8 }
  0x15   :  { %p1001_p10 = scmp.lt.s32.totalorder %s995_s0, %s995_s0 }
  0x17   :  { %p1002_p11 = por %p1001_p10, %p1000_p9 }
  0x19   :  { %p1003_p12 = pnand %p1002_p11, %p996_p8 }
  0x1b   :  { %1006 = shalt.err (!%p1003_p12)  }
  0x1c   :  { %s1107_s1 = smov [#allocation6]  }
  0x1d   :  { %19 = dma.vmem_to_smem %s17_s8, 16, %s1107_s1, [#allocation3] }
  0x1e   :  { %1079 = dma.done.wait [#allocation3], 48 }
  0x1f   :  { %1080 = vsyncadd [#allocation3], 4294967248 }
  0x20   :  { %21 = sfence }
  0x21   :  { %22 = vsyncpa [#allocation8], 0 }
  0x22   :  { %24 = vsyncpa [#allocation8 + $0x1], 0 }
  0x23   :  { %25 = vsyncpa [#allocation9], 0  ;;  %s1166_s2 = smov 0   ;;  %s1168_s11 = smov 0  }
  0x24   :  { %s1170_s12 = smov 0   ;;  %s1172_s13 = smov 0  }
  0x25 LB: > { %s1185_s14 = sadd.s32 4294967295, %s1103_s13   ;;  %s1188_s15 = sadd.s32 1, %s1103_s13   ;;  %s1103_s13 = sphi %s1172_s13, %s1337_s13   ;;  %s1099_s12 = sphi %s1170_s12, %s1336_s12   ;;  %s1095_s11 = sphi %s1168_s11, %s1335_s11   ;;  %s1091_s2 = sphi %s1166_s2, %s1334_s2  }
  0x26   : > { %s35_s16 = ssub.s32 %s1103_s13, %s1188_s15  ;;  %s38_s17 = sadd.s32 1, %s1099_s12 }
  0x27   : > { %p36_p13 = scmp.eq.s32.totalorder %s35_s16, 0  ;;  %p45_p0 = scmp.ne.s32.totalorder %s1099_s12, %s1095_s11 }
  0x28   : > { %p46_p1 = scmp.eq.s32.totalorder %s1103_s13, 0  ;;  %p51_p2 = scmp.ne.s32.totalorder %s1095_s11, %s1091_s2 }
  0x29   : > { %s1198_s18 = scalar_select %p36_p13, %s1099_s12, %s38_s17  }
  0x2a   : > { %p47_p3 = por %p46_p1, %p45_p0  ;;  %p52_p4 = scmp.eq.s32.totalorder %s1185_s14, 0 }
  0x2b   : > { %p920_p5 = scmp.lt.s32.totalorder %s1103_s13, 3  ;;  %s124_s20 = sand.u32 1, %s1099_s12  }
  0x2c   : > { %p1202_p6 = por %p52_p4, %p51_p2  ;;  %s902_s21 = smul.u32 24, %s124_s20 }
  0x2d   : > { %s710_s22 = smul.u32 384, %s1103_s13  ;;  %p1208_p7 = pnand %p920_p5, %p47_p3 }
  0x2e   : > { %s128_s27 = scalar_lea.vmem [#allocation7], %s902_s21  ;;  %s1220_s29 = scalar_lea.sflag [#allocation8], %s124_s20 }
  0x2f   : > { %s1215_s26 = scalar_lea.hbm %s1326_s3, %s710_s22  ;;  %s135_s28 = sshll.u32 %s128_s27, 4  ;;  %s1217_s28 = int_to_ptr.vmem [resolvable:$true] %s135_s28 }
  0x30   : > { %s1007_s30 = scalar_lea.hbm %s1215_s26, 384  ;;  %p1009_p10 = pneg %p1208_p7 }
  0x31   : > { %p1008_p9 = scmp.ne.s32.totalorder %s1215_s26, %s1007_s30  ;;  %s1012_s8 = scalar_lea.hbm %s1326_s3, 1152 }
  0x32   : > { %p1013_p13 = scmp.lt.u32.totalorder %s1215_s26, %s1326_s3  ;;  %p1014_p0 = scmp.lt.u32.totalorder %s1012_s8, %s1007_s30 }
  0x33   : > { %p1010_p11 = pnand %p1009_p10, %p1008_p9  ;;  %p1016_p2 = scmp.lt.u32.totalorder %s1007_s30, %s1215_s26 }
  0x34   : > { %p1015_p1 = por %p1014_p0, %p1013_p13 }
  0x35   : > { %p1011_p12 = pneg %p1010_p11 }
  0x36   : > { %p1017_p3 = por %p1016_p2, %p1015_p1 }
  0x38   : > { %p1018_p4 = pnand %p1017_p3, %p1011_p12 }
  0x3a   : > { %1021 = shalt.err (!%p1018_p4)
}
  0x3b   : > { %s1022_s0 = scalar_lea.vmem %s1217_s28, 384  ;;  %s1108_s1 = smov [#allocation7]  }
  0x3c   : > { %p1023_p5 = scmp.ne.s32.totalorder %s1217_s28, %s1022_s0  ;;  %s1027_s2 = sshll.u32 %s1108_s1, 4  ;;  %s1028_s2 = int_to_ptr.vmem [resolvable:$false] %s1027_s2 }
  0x3d   : > { %s1029_s16 = scalar_lea.vmem %s1028_s2, 768  ;;  %p1030_p8 = scmp.lt.s32.totalorder %s1217_s28, %s1028_s2 }
  0x3e   : > { %p1025_p9 = pnand %p1023_p5, %p1009_p10  ;;  %p1031_p13 = scmp.lt.s32.totalorder %s1029_s16, %s1022_s0 }
  0x40   : > { %p1026_p11 = pneg %p1025_p9  ;;  %p1032_p0 = por %p1031_p13, %p1030_p8 }
  0x42   : > { %p1033_p1 = pnand %p1032_p0, %p1026_p11 }
  0x44   : > { %1036 = shalt.err (!%p1033_p1)
}
  0x45   : > { %s1109_s17 = smov 64   ;;  %s1110_s20 = smov 4  }
  0x46   : > { %919 = dma.hbm_to_vmem [thread:$0]  (!%p1208_p7), %s1215_s26, 384, %s1217_s28, %s1220_s29, %s1109_s17, %s1109_s17, %s1110_s20  }
  0x47   : > { %p151_p10 = scmp.lt.s32.totalorder %s1103_s13, 4  ;;  %p1333_p12 = scmp.ge.s32.totalorder %s1103_s13, 1 }
  0x49   : > { %p152_p2 = pnand %p1333_p12, %p151_p10 }
  0x4a   : > { %s157_s21 = sand.u32 (!%p152_p2), 1, %s1095_s11  }
  0x4b   : > { %155 = sbr.rel (%p152_p2) target bundleno = 1412 (0x584), region = 28  ;;  %s158_s24 = scalar_lea.sflag (!%p152_p2), [#allocation8], %s157_s21 }
  0x4c   : > { %s903_s22 = smul.u32 (!%p152_p2), 24, %s157_s21 }
  0x4e   : > { %s1252_s25 = scalar_lea.vmem (!%p152_p2), [#allocation7], %s903_s22 }
  0x52   : > { %1082 = dma.done.wait (%p1202_p6), %s158_s24, 384  }
  0x53   : > { %1084 = vsyncadd (%p1202_p6), %s158_s24, 4294966912  ;;  %s182_s27 = sld [smem:[#allocation4 + %s1185_s14]]  ;;  %p692_p7 = scmp.ne.s32.totalorder %s1185_s14, 0 }
  0x54   : > { %v1111_v0 = vmov (!%p692_p7), 0.0  }
  0x55   : > { %192 = vst [vmem:[#allocation10] sm:$0x1] (!%p692_p7), %v1111_v0 }
  0x56   : > { %191 = sbr.rel (%p692_p7) target bundleno = 93 (0x5d), region = 36 }
  0x59   : > { %p183_p8 = scmp.lt.s32.totalorder %s182_s27, 2 }
  0x5b   : > { %s1339_s27 = smov (!%p183_p8, %s182_s27), 2 }
  0x5c   : > { %s185_s26 = scalar_lea.vmem %s1327_s4, %s1339_s27 }
  0x5d PF: > { %s193_s28 = sld [smem:[#allocation5 + %s1185_s14]] }
  0x63   : > { %p693_p3 = scmp.eq.s32.totalorder %s193_s28, 0 }
  0x64   : > { %v1112_v1 = vmov (!%p693_p3), 0.0  }
  0x65   : > { %197 = sbr.rel (%p693_p3) target bundleno = 109 (0x6d), region = 40  ;;  %198 = vst [vmem:[#allocation2] sm:$0xff] (!%p693_p3), %v1112_v1  ;;  %199 = vst [vmem:[#allocation2 + $0x8] sm:$0xff] (!%p693_p3), %v1112_v1 }
  0x66   : > { %200 = vst [vmem:[#allocation2 + $0x10] sm:$0xff] (!%p693_p3), %v1112_v1  ;;  %201 = vst [vmem:[#allocation2 + $0x18] sm:$0xff] (!%p693_p3), %v1112_v1 }
  0x67   : > { %202 = vst [vmem:[#allocation2 + $0x20] sm:$0xff] (!%p693_p3), %v1112_v1  ;;  %203 = vst [vmem:[#allocation2 + $0x28] sm:$0xff] (!%p693_p3), %v1112_v1 }
  0x68   : > { %204 = vst [vmem:[#allocation2 + $0x30] sm:$0xff] (!%p693_p3), %v1112_v1  ;;  %205 = vst [vmem:[#allocation2 + $0x38] sm:$0xff] (!%p693_p3), %v1112_v1 }
  0x69   : > { %206 = vst [vmem:[#allocation2 + $0x40] sm:$0xff] (!%p693_p3), %v1112_v1  ;;  %207 = vst [vmem:[#allocation2 + $0x48] sm:$0xff] (!%p693_p3), %v1112_v1 }
  0x6a   : > { %208 = vst [vmem:[#allocation2 + $0x50] sm:$0xff] (!%p693_p3), %v1112_v1  ;;  %209 = vst [vmem:[#allocation2 + $0x58] sm:$0xff] (!%p693_p3), %v1112_v1 }
  0x6b   : > { %210 = vst [vmem:[#allocation2 + $0x60] sm:$0xff] (!%p693_p3), %v1112_v1  ;;  %211 = vst [vmem:[#allocation2 + $0x68] sm:$0xff] (!%p693_p3), %v1112_v1 }
  0x6c   : > { %212 = vst [vmem:[#allocation2 + $0x70] sm:$0xff] %v1112_v1  ;;  %213 = vst [vmem:[#allocation2 + $0x78] sm:$0xff] %v1112_v1 }
  0x6d PF: > { %v968_v2 = vld [vmem:[%s1252_s25] sm:$0xff]   ;;  %v969_v3 = vld [vmem:[%s1252_s25 + $0x8] sm:$0xff]   ;;  %v970_v4 = vld [vmem:[%s1252_s25 + $0x10] sm:$0xff]   ;;  %vm270_vm0 = vcmask 392192   ;;  %s1279_s19 = sld [smem:[#allocation6 + %s1185_s14]] }
  0x6e   : > { %254 = vxpose.xlu0.c.b16.start [1/3] (short) %v968_v2, 128  ;;  %756 = vmatprep.subr.bf16.mxu0 %v968_v2  ;;  %v222_v13 = vld [vmem:[#allocation2 + $0x10] sm:$0xff]  ;;  %v220_v14 = vld [vmem:[#allocation2] sm:$0xff]  ;;  %v223_v16 = vld [vmem:[#allocation2 + $0x18] sm:$0xff] }
  0x6f   : > { %757 = vmatpush3.bf16.msra.mxu0 %v968_v2  ;;  %896 = vmatprep.subr.bf16.mxu1 %v968_v2  ;;  %v221_v19 = vld [vmem:[#allocation2 + $0x8] sm:$0xff]  ;;  %v224_v26 = vld [vmem:[#allocation2 + $0x20] sm:$0xff] }
  0x70   : > { %758 = vmatprep.subr.bf16.mxu0 %v969_v3  ;;  %899 = vmatpush3.bf16.msra.mxu1 %v968_v2  ;;  %v226_v25 = vld [vmem:[#allocation2 + $0x30] sm:$0xff]  ;;  %v227_v28 = vld [vmem:[#allocation2 + $0x38] sm:$0xff]  ;;  %v225_v31 = vld [vmem:[#allocation2 + $0x28] sm:$0xff] }
  0x71   : > { %897 = vmatprep.subr.bf16.mxu1 %v969_v3  ;;  %v228_v38 = vld [vmem:[#allocation2 + $0x40] sm:$0xff]  ;;  %v229_v43 = vld [vmem:[#allocation2 + $0x48] sm:$0xff] }
  0x72   : > { %255 = vxpose.xlu0.c.b16.cont [2/3] (short) %v969_v3, 128  ;;  %v230_v37 = vld [vmem:[#allocation2 + $0x50] sm:$0xff]  ;;  %v231_v40 = vld [vmem:[#allocation2 + $0x58] sm:$0xff] }
  0x73   : > { %759 = vmatpush3.bf16.msra.mxu0 %v969_v3  ;;  %v234_v49 = vld [vmem:[#allocation2 + $0x70] sm:$0xff]  ;;  %v232_v50 = vld [vmem:[#allocation2 + $0x60] sm:$0xff]  ;;  %v235_v52 = vld [vmem:[#allocation2 + $0x78] sm:$0xff]  ;;  %p705_p6 = scmp.eq.s32.totalorder %s1279_s19, 0 }
  0x74   : > { %760 = vmatprep.subr.bf16.mxu0 %v970_v4  ;;  %900 = vmatpush3.bf16.msra.mxu1 %v969_v3  ;;  %v233_v55 = vld [vmem:[#allocation2 + $0x68] sm:$0xff]  ;;  %v1113_v0 = vmov (!%p705_p6), 0.0|0.0   ;;  %vm1114_vm1 = vmmov (!%p705_p6), 0   ;;  %v1115_v3 = vmov (!%p705_p6), 0.0   ;;  %vm518_vm2 = vcmask (!%p705_p6), 1040384  }
  0x75   : > { %898 = vmatprep.subr.bf16.mxu1 %v970_v4  ;;  %s1116_s7 = smov (!%p705_p6), 1e-24  }
  0x76   : > { %256 = vxpose.xlu0.c.b16.end [3/3] (short) %v970_v4, 128 }
  0x77   : > { %761 = vmatpush3.bf16.msra.mxu0 %v970_v4 }
  0x78   : > { %901 = vmatpush3.bf16.msra.mxu1 %v970_v4  ;;  %848 = vmatprep.subr.bf16.mxu0 (!%p705_p6), %v1113_v0 }
  0x79   : > { %872 = vmatprep.subr.bf16.mxu1 (!%p705_p6), %v1113_v0 }
  0xd4   : > { %v262_v5 = vpop.trf.xlu0 }
  0xd5   : > { %762 = vmatprep.mubr.msk.bf16.mxu0 %vm270_vm0, %v262_v5 }
  0xd8   : > { %v263_v6 = vpop.trf.xlu0 }
  0xd9   : > { %763 = vmatmul.mubr.msk.bf16.vlgmr.msra.gmra.mrb[0].mxu0 %vm270_vm0, %v263_v6 }
  0xdc   : > { %v264_v7 = vpop.trf.xlu0 }
  0xdd   : > { %766 = vmatprep.mubr.msk.bf16.mxu0 %vm270_vm0, %v264_v7 }
  0xe0   : > { %v265_v8 = vpop.trf.xlu0 }
  0xe1   : > { %767 = vmatmul.mubr.msk.bf16.gmra.mrb[4].mxu0 %vm270_vm0, %v265_v8 }
  0xe2   : > { %810 = vmatprep.mubr.msk.f32.mxu0 (!%p705_p6), %vm1114_vm1, %v1115_v3 }
  0xe4   : > { %v266_v9 = vpop.trf.xlu0 }
  0xe5   : > { %770 = vmatprep.mubr.msk.bf16.mxu1 %vm270_vm0, %v266_v9 }
  0xe8   : > { %v267_v10 = vpop.trf.xlu0 }
  0xe9   : > { %771 = vmatmul.mubr.msk.bf16.vlgmr.msra.gmra.mrb[0].mxu1 %vm270_vm0, %v267_v10 }
  0xec   : > { %v268_v11 = vpop.trf.xlu0 }
  0xed   : > { %774 = vmatprep.mubr.msk.bf16.mxu1 %vm270_vm0, %v268_v11 }
  0xf0   : > { %v269_v12 = vpop.trf.xlu0 }
  0xf1   : > { %775 = vmatmul.mubr.msk.bf16.gmra.mrb[4].mxu1 %vm270_vm0, %v269_v12 }
  0xf2   : > { %845 = vmatprep.mubr.msk.f32.mxu1 (!%p705_p6), %vm1114_vm1, %v1115_v3 }
 0x1ac   : > { %v764_v15 = vpop.f32.mrb[0].mxu0 }
 0x1ad   : > { %v394_v17 = vadd.f32 %v764_v15, %v222_v13  ;;  %v329_v18 = vpop.f32.mrb[1].mxu0 }
 0x1ae   : > { %v392_v20 = vadd.f32 %v329_v18, %v220_v14  ;;  %v765_v21 = vpop.f32.mrb[2].mxu0 }
 0x1af   : > { %410 = vst [vmem:[#allocation2 + $0x10] sm:$0xff] %v394_v17  ;;  %v395_v22 = vadd.f32 %v765_v21, %v223_v16  ;;  %v332_v23 = vpop.f32.mrb[3].mxu0 }
 0x1b0   : > { %408 = vst [vmem:[#allocation2] sm:$0xff] %v392_v20  ;;  %v393_v24 = vadd.f32 %v332_v23, %v221_v19  ;;  %v445_v23 = vld [vmem:[%s185_s26] sm:$0x1] (!%p705_p6) }
 0x1b1   : > { %411 = vst [vmem:[#allocation2 + $0x18] sm:$0xff] %v395_v22 }
 0x1b2   : > { %409 = vst [vmem:[#allocation2 + $0x8] sm:$0xff] %v393_v24 }
 0x1b4   : > { %v768_v27 = vpop.f32.mrb[4].mxu0 }
 0x1b5   : > { %v398_v29 = vadd.f32 %v768_v27, %v226_v25  ;;  %v345_v30 = vpop.f32.mrb[5].mxu0 }
 0x1b6   : > { %v396_v32 = vadd.f32 %v345_v30, %v224_v26  ;;  %v769_v33 = vpop.f32.mrb[6].mxu0  ;;  %v431_v63 = vld [vmem:[#allocation2 + $0x10] sm:$0xff] (!%p705_p6) }
 0x1b7   : > { %414 = vst [vmem:[#allocation2 + $0x30] sm:$0xff] %v398_v29  ;;  %v399_v34 = vadd.f32 %v769_v33, %v227_v28  ;;  %v348_v35 = vpop.f32.mrb[7].mxu0  ;;  %v429_v61 = vld [vmem:[#allocation2] sm:$0xff] (!%p705_p6) }
 0x1b8   : > { %412 = vst [vmem:[#allocation2 + $0x20] sm:$0xff] %v396_v32  ;;  %v397_v36 = vadd.f32 %v348_v35, %v225_v31  ;;  %v432_v2 = vld [vmem:[#allocation2 + $0x18] sm:$0xff] (!%p705_p6) }
 0x1b9   : > { %415 = vst [vmem:[#allocation2 + $0x38] sm:$0xff] %v399_v34  ;;  %v430_v62 = vld [vmem:[#allocation2 + $0x8] sm:$0xff] (!%p705_p6)  ;;  %v852_v4 = vpack.c.bf16 (!%p705_p6), %v432_v2, %v431_v63 }
 0x1ba   : > { %413 = vst [vmem:[#allocation2 + $0x28] sm:$0xff] %v397_v36  ;;  %v849_v1 = vpack.c.bf16 (!%p705_p6), %v430_v62, %v429_v61 }
 0x1bc   : > { %v772_v39 = vpop.f32.mrb[0].mxu1  ;;  %850 = vmatpush3.bf16.msra.mxu0 (!%p705_p6), %v849_v1  ;;  %874 = vmatpush3.bf16.msra.mxu1 (!%p705_p6), %v849_v1 }
 0x1bd   : > { %v402_v41 = vadd.f32 %v772_v39, %v230_v37  ;;  %v361_v42 = vpop.f32.mrb[1].mxu1  ;;  %851 = vmatprep.subr.bf16.mxu0 (!%p705_p6), %v1113_v0  ;;  %875 = vmatprep.subr.bf16.mxu1 (!%p705_p6), %v1113_v0 }
 0x1be   : > { %v400_v44 = vadd.f32 %v361_v42, %v228_v38  ;;  %v773_v45 = vpop.f32.mrb[2].mxu1  ;;  %v435_v8 = vld [vmem:[#allocation2 + $0x30] sm:$0xff] (!%p705_p6) }
 0x1bf   : > { %418 = vst [vmem:[#allocation2 + $0x50] sm:$0xff] %v402_v41  ;;  %v403_v46 = vadd.f32 %v773_v45, %v231_v40  ;;  %v364_v47 = vpop.f32.mrb[3].mxu1  ;;  %v433_v5 = vld [vmem:[#allocation2 + $0x20] sm:$0xff] (!%p705_p6) }
 0x1c0   : > { %416 = vst [vmem:[#allocation2 + $0x40] sm:$0xff] %v400_v44  ;;  %v401_v48 = vadd.f32 %v364_v47, %v229_v43  ;;  %853 = vmatpush3.bf16.msra.mxu0 (!%p705_p6), %v852_v4  ;;  %877 = vmatpush3.bf16.msra.mxu1 (!%p705_p6), %v852_v4  ;;  %v436_v9 = vld [vmem:[#allocation2 + $0x38] sm:$0xff] (!%p705_p6) }
 0x1c1   : > { %419 = vst [vmem:[#allocation2 + $0x58] sm:$0xff] %v403_v46  ;;  %v434_v6 = vld [vmem:[#allocation2 + $0x28] sm:$0xff] (!%p705_p6)  ;;  %854 = vmatprep.subr.bf16.mxu0 (!%p705_p6), %v1113_v0  ;;  %878 = vmatprep.subr.bf16.mxu1 (!%p705_p6), %v1113_v0  ;;  %v858_v10 = vpack.c.bf16 (!%p705_p6), %v436_v9, %v435_v8 }
 0x1c2   : > { %417 = vst [vmem:[#allocation2 + $0x48] sm:$0xff] %v401_v48  ;;  %v855_v7 = vpack.c.bf16 (!%p705_p6), %v434_v6, %v433_v5 }
 0x1c4   : > { %v776_v51 = vpop.f32.mrb[4].mxu1  ;;  %428 = sbr.rel (%p705_p6) target bundleno = 1387 (0x56b), region = 44  ;;  %856 = vmatpush3.bf16.msra.mxu0 (!%p705_p6), %v855_v7  ;;  %880 = vmatpush3.bf16.msra.mxu1 (!%p705_p6), %v855_v7 }
 0x1c5   : > { %v406_v53 = vadd.f32 %v776_v51, %v234_v49  ;;  %v377_v54 = vpop.f32.mrb[5].mxu1  ;;  %857 = vmatprep.subr.bf16.mxu0 (!%p705_p6), %v1113_v0  ;;  %881 = vmatprep.subr.bf16.mxu1 (!%p705_p6), %v1113_v0 }
 0x1c6   : > { %v404_v56 = vadd.f32 %v377_v54, %v232_v50  ;;  %v777_v57 = vpop.f32.mrb[6].mxu1  ;;  %v439_v14 = vld [vmem:[#allocation2 + $0x50] sm:$0xff] (!%p705_p6) }
 0x1c7   : > { %422 = vst [vmem:[#allocation2 + $0x70] sm:$0xff] %v406_v53  ;;  %v407_v58 = vadd.f32 %v777_v57, %v235_v52  ;;  %v380_v59 = vpop.f32.mrb[7].mxu1  ;;  %v437_v11 = vld [vmem:[#allocation2 + $0x40] sm:$0xff] (!%p705_p6)  ;;  %v606_v52 = vld [vmem:[#allocation10] sm:$0x1] (!%p705_p6) }
 0x1c8   : > { %420 = vst [vmem:[#allocation2 + $0x60] sm:$0xff] %v404_v56  ;;  %v405_v60 = vadd.f32 %v380_v59, %v233_v55  ;;  %859 = vmatpush3.bf16.msra.mxu0 (!%p705_p6), %v858_v10  ;;  %883 = vmatpush3.bf16.msra.mxu1 (!%p705_p6), %v858_v10  ;;  %v440_v15 = vld [vmem:[#allocation2 + $0x58] sm:$0xff] (!%p705_p6) }
 0x1c9   : > { %423 = vst [vmem:[#allocation2 + $0x78] sm:$0xff] %v407_v58  ;;  %v438_v12 = vld [vmem:[#allocation2 + $0x48] sm:$0xff] (!%p705_p6)  ;;  %860 = vmatprep.subr.bf16.mxu0 (!%p705_p6), %v1113_v0  ;;  %884 = vmatprep.subr.bf16.mxu1 (!%p705_p6), %v1113_v0  ;;  %v864_v16 = vpack.c.bf16 (!%p705_p6), %v440_v15, %v439_v14 }
 0x1ca   : > { %421 = vst [vmem:[#allocation2 + $0x68] sm:$0xff] %v405_v60  ;;  %v861_v13 = vpack.c.bf16 (!%p705_p6), %v438_v12, %v437_v11 }
 0x1cc   : > { %862 = vmatpush3.bf16.msra.mxu0 %v861_v13  ;;  %886 = vmatpush3.bf16.msra.mxu1 %v861_v13 }
 0x1cd   : > { %863 = vmatprep.subr.bf16.mxu0 %v1113_v0  ;;  %887 = vmatprep.subr.bf16.mxu1 %v1113_v0 }
 0x1ce   : > { %v443_v20 = vld [vmem:[#allocation2 + $0x70] sm:$0xff] }
 0x1cf   : > { %v441_v17 = vld [vmem:[#allocation2 + $0x60] sm:$0xff] }
 0x1d0   : > { %865 = vmatpush3.bf16.msra.mxu0 %v864_v16  ;;  %889 = vmatpush3.bf16.msra.mxu1 %v864_v16  ;;  %v444_v21 = vld [vmem:[#allocation2 + $0x78] sm:$0xff] }
 0x1d1   : > { %v442_v18 = vld [vmem:[#allocation2 + $0x68] sm:$0xff]  ;;  %866 = vmatprep.subr.bf16.mxu0 %v1113_v0  ;;  %890 = vmatprep.subr.bf16.mxu1 %v1113_v0  ;;  %v870_v22 = vpack.c.bf16 %v444_v21, %v443_v20 }
 0x1d2   : > { %v867_v19 = vpack.c.bf16 %v442_v18, %v441_v17 }
 0x1d4   : > { %868 = vmatpush3.bf16.msra.mxu0 %v867_v19  ;;  %892 = vmatpush3.bf16.msra.mxu1 %v867_v19 }
 0x1d5   : > { %869 = vmatprep.subr.bf16.mxu0 %v1113_v0  ;;  %893 = vmatprep.subr.bf16.mxu1 %v1113_v0 }
 0x1d8   : > { %871 = vmatpush3.bf16.msra.mxu0 %v870_v22  ;;  %895 = vmatpush3.bf16.msra.mxu1 %v870_v22 }
 0x1db   : > { %811 = vmatmul.mubr.f32.vlgmr.msra.gmra.mrb[0].mxu0 %v445_v23 }
 0x2ae   : > { %v512_v24 = vpop.f32.mrb[0].mxu0 }
 0x2af   : > { %v516_v25 = vsub.f32 %v512_v24, %v445_v23  ;;  %v812_v26 = vpop.f32.mrb[1].mxu0 }
 0x2b1   : > { %v517_v27 = vmul.f32 %v516_v25, %v516_v25 }
 0x2b3   : > { %v519_v28 = vsel %vm518_vm2, %v517_v27, 0.0 }
 0x2b4   : > { %520 = vadd.xlane.f32.xlu0 %v519_v28 }
 0x341   : > { %v521_v29 = vpop.xlane.xlu0 %520 }
 0x342   : > { %v522_v30 = vrot.slane %v521_v29, 4 }
 0x344   : > { %v523_v31 = vadd.f32 %v522_v30, %v521_v29 }
 0x346   : > { %v524_v32 = vrot.slane %v523_v31, 2 }
 0x348   : > { %v525_v33 = vadd.f32 %v524_v32, %v523_v31 }
 0x34a   : > { %v526_v34 = vrot.slane %v525_v33, 1 }
 0x34c   : > { %v527_v35 = vadd.f32 %v526_v34, %v525_v33 }
 0x34e   : > { %904 = vpush %v527_v35 }
 0x37f   : > { %s905_s6 = spop %904 }
 0x380   : > { %s529_s8 = smax.f32 %s1116_s7, %s905_s6 }
 0x381   : > { %v530_v36 = vstv %s529_s8 }
 0x382   : > { %971 = vrsqrt.f32 %v530_v36 }
 0x38c   : > { %v972_v37 = vpop.eup %971 }
 0x38d   : > { %906 = vpush %v972_v37 }
 0x3be   : > { %s907_s9 = spop %906 }
 0x3bf   : > { %v533_v38 = vstv %s907_s9 }
 0x3c0   : > { %v534_v39 = vmul.f32 %v533_v38, %v516_v25 }
 0x3c2   : > { %846 = vmatmul.mubr.f32.vlgmr.msra.gmra.mrb[0].mxu1 %v534_v39 }
 0x495   : > { %v601_v40 = vpop.f32.mrb[0].mxu1 }
 0x496   : > { %v605_v41 = vsub.f32 %v601_v40, %v534_v39  ;;  %v847_v42 = vpop.f32.mrb[1].mxu1 }
 0x498   : > { %v607_v43 = vmul.f32 %v605_v41, %v605_v41 }
 0x49a   : > { %v608_v44 = vsel %vm518_vm2, %v607_v43, 0.0 }
 0x49b   : > { %609 = vadd.xlane.f32.xlu0 %v608_v44 }
 0x528   : > { %v610_v45 = vpop.xlane.xlu0 %609 }
 0x529   : > { %v611_v46 = vrot.slane %v610_v45, 4 }
 0x52b   : > { %v612_v47 = vadd.f32 %v611_v46, %v610_v45 }
 0x52d   : > { %v613_v48 = vrot.slane %v612_v47, 2 }
 0x52f   : > { %v614_v49 = vadd.f32 %v613_v48, %v612_v47 }
 0x531   : > { %v615_v50 = vrot.slane %v614_v49, 1 }
 0x533   : > { %v616_v51 = vadd.f32 %v615_v50, %v614_v49 }
 0x535   : > { %908 = vpush %v616_v51 }
 0x566   : > { %s909_s10 = spop %908 }
 0x567   : > { %v618_v53 = vstv %s909_s10 }
 0x568   : > { %v619_v54 = vadd.f32 %v618_v53, %v606_v52 }
 0x56a   : > { %620 = vst [vmem:[#allocation10] sm:$0x1] %v619_v54 }
 0x56b PF: > { %p921_p4 = scmp.eq.s32.totalorder %s1185_s14, 2  ;;  %s1117_s0 = smov [#allocation10]  }
 0x56c   : > { %s628_s1 = sshll.u32 %s1117_s0, 4  ;;  %s629_s1 = int_to_ptr.vmem [resolvable:$true] %s628_s1 }
 0x56d   : > { %s1037_s2 = scalar_lea.vmem %s629_s1, 16  ;;  %s1043_s16 = scalar_lea.vmem %s629_s1, 32 }
 0x56e   : > { %p1038_p5 = scmp.ne.s32.totalorder %s629_s1, %s1037_s2  ;;  %p1044_p13 = scmp.lt.s32.totalorder %s629_s1, %s629_s1 }
 0x56f   : > { %p1045_p0 = scmp.lt.s32.totalorder %s1043_s16, %s1037_s2 }
 0x570   : > { %p1039_p9 = pnand %p1038_p5, %p921_p4 }
 0x571   : > { %p1046_p1 = por %p1045_p0, %p1044_p13 }
 0x572   : > { %p1040_p11 = pneg %p1039_p9 }
 0x574   : > { %p1047_p10 = pnand %p1046_p1, %p1040_p11 }
 0x576   : > { %1050 = shalt.err (!%p1047_p10)
}
 0x577   : > { %s1051_s21 = scalar_lea.hbm %s1328_s5, 16 }
 0x578   : > { %p1052_p12 = scmp.ne.s32.totalorder %s1328_s5, %s1051_s21  ;;  %p1057_p7 = scmp.lt.u32.totalorder %s1051_s21, %s1328_s5 }
 0x57a   : > { %p1053_p2 = pnand %p1052_p12, %p921_p4 }
 0x57c   : > { %p1054_p8 = pneg %p1053_p2 }
 0x57e   : > { %p1059_p3 = pnand %p1057_p7, %p1054_p8 }
 0x580   : > { %1062 = shalt.err (!%p1059_p3)
}
 0x581   : > { %913 = dma.vmem_to_hbm [thread:$0]  (%p921_p4), %s629_s1, 16, %s1328_s5, [#allocation9]  }
 0x582   : > { %1086 = dma.done.wait (%p921_p4), [#allocation9], 16  }
 0x583   : > { %1088 = vsyncadd (%p921_p4), [#allocation9], 4294967280 }
 0x584 PF: > { %p28_p6 = scmp.ge.s32.totalorder %s1188_s15, 5   ;;  %s1334_s2 = smov %s1095_s11 }
 0x585   : > { %s1335_s11 = smov %s1099_s12  ;;  %s1336_s12 = smov %s1198_s18 }
 0x586   : > { %s1337_s13 = smov %s1188_s15  ;;  %30 = sbr.rel (!%p28_p6) target bundleno = 37 (0x25), region = 80 }
 0x58d   :  { %641 = vsyncpa [#allocation8], 1 }
 0x58e   :  { %643 = vsyncpa [#allocation8 + $0x1], 1 }
 0x58f   :  { %644 = vsyncpa [#allocation9], 1 }
 0x590   :  { %646 = vsyncpa [#allocation9 + $0x1], 1 }

</bundles_post_ra>
